<compile_context>
chip_gen: v6e
topology: v6e:2x2x1
jax: 0.10.0
libtpu: 0.0.40
codegen_flags: <defaults>
</compile_context>

<pallas_src>
import jax
import jax.numpy as jnp
from jax.experimental import pallas as pl
from jax.experimental.pallas import tpu as pltpu

K_IN = 20 * 10    # flattened input features (200)
N_OUT = 5         # logical output features
N_PAD = 128       # lane-dense padded output width (unmasked vst)
_LANE = 128
_SUBLANE = 8


def _round_up(x, m):
    return ((x + m - 1) // m) * m


def _vmem_budget_bytes():
    """~85% of this generation's VMEM (v7x: ~54 MiB, v5e/v6e: ~108 MiB)."""
    cap = 64 << 20  # conservative fallback (v7x per-TC VMEM)
    try:
        info = pltpu.get_tpu_info()
        cap = int(getattr(info, "vmem_capacity_bytes", cap))
    except Exception:
        pass
    return int(cap * 0.85)


# ---------------------------------------------------------------------------
# Kernel: one batch tile through the whole 4-layer MLP.  Weights/biases stay
# VMEM-resident across the batch grid (constant index_maps).
# ---------------------------------------------------------------------------
def _mlp_kernel(x_ref, w1_ref, b1_ref, w2_ref, b2_ref,
                w3_ref, b3_ref, w4_ref, b4_ref, o_ref):
    # In-kernel f32 -> bf16 cast of the activation tile (saves an HBM pass).
    x = x_ref[...].astype(w1_ref.dtype)

    # Layer 1: (TB, 200) @ (200, S_pad) -> f32 acc, +bias, ReLU
    h = jnp.dot(x, w1_ref[...], preferred_element_type=jnp.float32)
    h = jnp.maximum(h + b1_ref[...], 0.0)
    # Layer 2: (TB, S_pad) @ (S_pad, S_pad)
    h = jnp.dot(h.astype(w2_ref.dtype), w2_ref[...],
                preferred_element_type=jnp.float32)
    h = jnp.maximum(h + b2_ref[...], 0.0)
    # Layer 3: (TB, S_pad) @ (S_pad, S_pad)
    h = jnp.dot(h.astype(w3_ref.dtype), w3_ref[...],
                preferred_element_type=jnp.float32)
    h = jnp.maximum(h + b3_ref[...], 0.0)
    # Output layer: (TB, S_pad) @ (S_pad, 128)  (columns >= 5 are zero padding)
    out = jnp.dot(h.astype(w4_ref.dtype), w4_ref[...],
                  preferred_element_type=jnp.float32) + b4_ref[...]
    o_ref[...] = out.astype(o_ref.dtype)


# ---------------------------------------------------------------------------
# One-time parameter preparation (pad + cast).  Do NOT call per forward pass.
# ---------------------------------------------------------------------------
def prepare_params(params, *, compute_dtype=jnp.bfloat16):
    """Pad weights to lane-dense shapes and cast to the MXU compute dtype.

    Input weights stored as (in_features, out_features); biases as (1, out).
    Zero padding is numerically exact for this MLP (zeros stay zero through
    matmul / bias-add / ReLU and the final [:, :5] slice drops padded cols).
    """
    assert params["w1"].shape[0] == K_IN, params["w1"].shape
    S = params["w1"].shape[1]
    S_pad = _round_up(max(S, _LANE), _LANE)

    def padw(w, row_pad, col_pad):
        return jnp.pad(w, ((0, row_pad), (0, col_pad))).astype(compute_dtype)

    def padb(b, col_pad):
        # Biases stay f32: they are added to the f32 accumulator.
        return jnp.pad(b, ((0, 0), (0, col_pad))).astype(jnp.float32)

    return {
        "w1": padw(params["w1"], 0, S_pad - S),
        "b1": padb(params["b1"], S_pad - S),
        "w2": padw(params["w2"], S_pad - S, S_pad - S),
        "b2": padb(params["b2"], S_pad - S),
        "w3": padw(params["w3"], S_pad - S, S_pad - S),
        "b3": padb(params["b3"], S_pad - S),
        "w4": padw(params["w4"], S_pad - S, N_PAD - N_OUT),
        "b4": padb(params["b4"], N_PAD - N_OUT),
    }


# ---------------------------------------------------------------------------
# Forward pass (activation path only).
# ---------------------------------------------------------------------------
def net2_forward(x, prepped, *, batch_tile=512, weight_buffering=1,
                 out_dtype=jnp.float32):
    """x: (B, 20, 10) float32.  prepped: output of prepare_params()."""
    B = x.shape[0]
    S_pad = prepped["w1"].shape[1]
    out_itemsize = jnp.dtype(out_dtype).itemsize

    # ---- activation glue: flatten only (no pad/cast HBM pass over x) -------
    x_flat = x.reshape(B, K_IN).astype(jnp.float32)

    # Batch tile: sublane-aligned, capped at batch_tile, and split into at
    # least two grid blocks when B allows it (v7x megacore utilization).
    align = _SUBLANE if out_itemsize >= 4 else 16
    TB = max(align, _round_up(min(int(batch_tile), _round_up(B, align)), align))
    if B >= 2 * align and _round_up(B, TB) // TB < 2:
        TB = _round_up((B + 1) // 2, align)
    B_pad = _round_up(B, TB)
    n_blocks = B_pad // TB
    if B_pad != B:
        x_flat = jnp.pad(x_flat, ((0, B_pad - B), (0, 0)))

    # ---- VMEM budget / resident footprint check ----------------------------
    param_keys = ("w1", "b1", "w2", "b2", "w3", "b3", "w4", "b4")
    weight_bytes = sum(int(prepped[k].size) * jnp.dtype(prepped[k].dtype).itemsize
                       for k in param_keys)
    act_bytes = 2 * TB * (K_IN * 4 + N_PAD * out_itemsize)  # double-buffered x/out
    vmem_limit = _vmem_budget_bytes()
    footprint = weight_buffering * weight_bytes + act_bytes
    if footprint > vmem_limit:
        # TODO(synk): add a tiled large-S path (grid over the SxS layers' K/N
        # axes with a VMEM f32 accumulator + pl.when init/finalize) instead of
        # whole-weight residency.
        raise NotImplementedError(
            f"resident-weight footprint {footprint} B exceeds VMEM budget "
            f"{vmem_limit} B; reduce hidden size or batch_tile")

    # ---- cost estimate (what the kernel actually moves) ---------------------
    flops = 2 * B_pad * (K_IN * S_pad + 2 * S_pad * S_pad + S_pad * N_PAD)
    bytes_accessed = (B_pad * K_IN * 4          # f32 activations in
                      + weight_bytes            # bf16 weights + f32 biases
                      + B_pad * N_PAD * out_itemsize)  # padded output writeback

    def build(single_buffered_weights):
        def resident(shape):
            kwargs = ({"pipeline_mode": pl.Buffered(1)}
                      if single_buffered_weights else {})
            return pl.BlockSpec(shape, lambda i, _nd=len(shape): (0,) * _nd,
                                **kwargs)

        return pl.pallas_call(
            _mlp_kernel,
            out_shape=jax.ShapeDtypeStruct((B_pad, N_PAD), out_dtype),
            grid=(n_blocks,),
            in_specs=[
                # x: only pipelined operand; K_IN == full array dim is legal.
                pl.BlockSpec((TB, K_IN), lambda i: (i, 0)),
                resident(prepped["w1"].shape), resident(prepped["b1"].shape),
                resident(prepped["w2"].shape), resident(prepped["b2"].shape),
                resident(prepped["w3"].shape), resident(prepped["b3"].shape),
                resident(prepped["w4"].shape), resident(prepped["b4"].shape),
            ],
            out_specs=pl.BlockSpec((TB, N_PAD), lambda i: (i, 0)),
            compiler_params=pltpu.CompilerParams(
                dimension_semantics=("parallel",),  # megacore on v7x
                vmem_limit_bytes=vmem_limit,
            ),
            cost_estimate=pl.CostEstimate(
                flops=flops, transcendentals=0, bytes_accessed=bytes_accessed),
        )

    args = (x_flat,
            prepped["w1"], prepped["b1"], prepped["w2"], prepped["b2"],
            prepped["w3"], prepped["b3"], prepped["w4"], prepped["b4"])

    if weight_buffering == 1:
        try:
            out = build(True)(*args)
        except Exception:
            # Buffered(1) residency not supported by this JAX/Mosaic build:
            # fall back to default double-buffered (still correct, more VMEM).
            out = build(False)(*args)
    else:
        out = build(False)(*args)

    # Strip batch / output-lane padding outside the kernel.
    return out[:B, :N_OUT]


# ---------------------------------------------------------------------------
# Synthetic parameters + pure-JAX reference.
# ---------------------------------------------------------------------------
def init_params(key, size):
    """Deterministic synthetic parameters matching net2(size) shapes (f32)."""
    ks = jax.random.split(key, 8)

    def lin(kw, kb, fan_in, fan_out):
        scale = 1.0 / jnp.sqrt(jnp.float32(fan_in))
        w = jax.random.uniform(kw, (fan_in, fan_out), jnp.float32, -scale, scale)
        b = jax.random.uniform(kb, (1, fan_out), jnp.float32, -scale, scale)
        return w, b

    w1, b1 = lin(ks[0], ks[1], K_IN, size)
    w2, b2 = lin(ks[2], ks[3], size, size)
    w3, b3 = lin(ks[4], ks[5], size, size)
    w4, b4 = lin(ks[6], ks[7], size, N_OUT)
    return {"w1": w1, "b1": b1, "w2": w2, "b2": b2,
            "w3": w3, "b3": b3, "w4": w4, "b4": b4}


def _reference(x, params):
    """Pure-JAX f32 reference for correctness check."""
    h = x.reshape(x.shape[0], -1)
    h = jnp.maximum(h @ params["w1"] + params["b1"], 0.0)
    h = jnp.maximum(h @ params["w2"] + params["b2"], 0.0)
    h = jnp.maximum(h @ params["w3"] + params["b3"], 0.0)
    return h @ params["w4"] + params["b4"]


if __name__ == "__main__":
    key = jax.random.PRNGKey(0)
    k_x, k_p = jax.random.split(key)

    batch, size = 8, 32
    x = jax.random.normal(k_x, (batch, 20, 10), dtype=jnp.float32)
    params = init_params(k_p, size)

    prepped = prepare_params(params)          # one-time pad + bf16 cast
    out = net2_forward(x, prepped)            # per-call: activation path only
    out = jax.block_until_ready(out)

    ref = _reference(x, params)
    assert out.shape == (batch, N_OUT), out.shape
    # bf16 MXU path with f32 accumulation -> relaxed tolerance vs f32 reference.
    assert jnp.allclose(out, ref, atol=3e-2, rtol=3e-2), "mismatch vs reference"

    print("KERNEL_OK")
</pallas_src>

<mosaic_0001>
module attributes {stable_mosaic.version = 11 : i64} {
  func.func @_mlp_kernel(%arg0: i32, %arg1: memref<8x200xf32, #tpu.memory_space<vmem>>, %arg2: memref<200x128xbf16, #tpu.memory_space<vmem>>, %arg3: memref<1x128xf32, #tpu.memory_space<vmem>>, %arg4: memref<128x128xbf16, #tpu.memory_space<vmem>>, %arg5: memref<1x128xf32, #tpu.memory_space<vmem>>, %arg6: memref<128x128xbf16, #tpu.memory_space<vmem>>, %arg7: memref<1x128xf32, #tpu.memory_space<vmem>>, %arg8: memref<128x128xbf16, #tpu.memory_space<vmem>>, %arg9: memref<1x128xf32, #tpu.memory_space<vmem>>, %arg10: memref<8x128xf32, #tpu.memory_space<vmem>>) attributes {dimension_semantics = [#tpu.dimension_semantics<parallel>], iteration_bounds = array<i64: 1>, scalar_prefetch = 0 : i64, scratch_operands = 0 : i64, tpu.core_type = #tpu.core_type<tc>, window_params = [{transform_indices = @transform_0, window_bounds = array<i64: 8, 200>}, {pipeline_mode = #tpu.pipeline_mode<synchronous>, transform_indices = @transform_1, window_bounds = array<i64: 200, 128>}, {pipeline_mode = #tpu.pipeline_mode<synchronous>, transform_indices = @transform_2, window_bounds = array<i64: 1, 128>}, {pipeline_mode = #tpu.pipeline_mode<synchronous>, transform_indices = @transform_3, window_bounds = array<i64: 128, 128>}, {pipeline_mode = #tpu.pipeline_mode<synchronous>, transform_indices = @transform_4, window_bounds = array<i64: 1, 128>}, {pipeline_mode = #tpu.pipeline_mode<synchronous>, transform_indices = @transform_5, window_bounds = array<i64: 128, 128>}, {pipeline_mode = #tpu.pipeline_mode<synchronous>, transform_indices = @transform_6, window_bounds = array<i64: 1, 128>}, {pipeline_mode = #tpu.pipeline_mode<synchronous>, transform_indices = @transform_7, window_bounds = array<i64: 128, 128>}, {pipeline_mode = #tpu.pipeline_mode<synchronous>, transform_indices = @transform_8, window_bounds = array<i64: 1, 128>}, {transform_indices = @transform_9, window_bounds = array<i64: 8, 128>}]} {
    %c0 = arith.constant 0 : index
    %c0_0 = arith.constant 0 : index
    %0 = vector.load %arg1[%c0, %c0_0] : memref<8x200xf32, #tpu.memory_space<vmem>>, vector<8x200xf32>
    %1 = arith.truncf %0 : vector<8x200xf32> to vector<8x200xbf16>
    %c0_1 = arith.constant 0 : index
    %c0_2 = arith.constant 0 : index
    %2 = vector.load %arg2[%c0_1, %c0_2] : memref<200x128xbf16, #tpu.memory_space<vmem>>, vector<200x128xbf16>
    %cst = arith.constant dense<0.000000e+00> : vector<8x128xf32>
    %3 = tpu.matmul %1, %2, %cst {dimension_numbers = #tpu.dot_dimension_numbers<[1], [0], [0], [1], [0, 0, 1, 1], [], []>} : vector<8x200xbf16>, vector<200x128xbf16>, vector<8x128xf32> -> vector<8x128xf32>
    %c0_3 = arith.constant 0 : index
    %c0_4 = arith.constant 0 : index
    %4 = vector.load %arg3[%c0_3, %c0_4] : memref<1x128xf32, #tpu.memory_space<vmem>>, vector<1x128xf32>
    %5 = vector.broadcast %4 : vector<1x128xf32> to vector<8x128xf32>
    %6 = arith.addf %3, %5 : vector<8x128xf32>
    %cst_5 = arith.constant 0.000000e+00 : f32
    %7 = vector.broadcast %cst_5 : f32 to vector<8x128xf32>
    %8 = arith.maximumf %6, %7 : vector<8x128xf32>
    %9 = arith.truncf %8 : vector<8x128xf32> to vector<8x128xbf16>
    %c0_6 = arith.constant 0 : index
    %c0_7 = arith.constant 0 : index
    %10 = vector.load %arg4[%c0_6, %c0_7] : memref<128x128xbf16, #tpu.memory_space<vmem>>, vector<128x128xbf16>
    %cst_8 = arith.constant dense<0.000000e+00> : vector<8x128xf32>
    %11 = tpu.matmul %9, %10, %cst_8 {dimension_numbers = #tpu.dot_dimension_numbers<[1], [0], [0], [1], [0, 0, 1, 1], [], []>} : vector<8x128xbf16>, vector<128x128xbf16>, vector<8x128xf32> -> vector<8x128xf32>
    %c0_9 = arith.constant 0 : index
    %c0_10 = arith.constant 0 : index
    %12 = vector.load %arg5[%c0_9, %c0_10] : memref<1x128xf32, #tpu.memory_space<vmem>>, vector<1x128xf32>
    %13 = vector.broadcast %12 : vector<1x128xf32> to vector<8x128xf32>
    %14 = arith.addf %11, %13 : vector<8x128xf32>
    %cst_11 = arith.constant 0.000000e+00 : f32
    %15 = vector.broadcast %cst_11 : f32 to vector<8x128xf32>
    %16 = arith.maximumf %14, %15 : vector<8x128xf32>
    %17 = arith.truncf %16 : vector<8x128xf32> to vector<8x128xbf16>
    %c0_12 = arith.constant 0 : index
    %c0_13 = arith.constant 0 : index
    %18 = vector.load %arg6[%c0_12, %c0_13] : memref<128x128xbf16, #tpu.memory_space<vmem>>, vector<128x128xbf16>
    %cst_14 = arith.constant dense<0.000000e+00> : vector<8x128xf32>
    %19 = tpu.matmul %17, %18, %cst_14 {dimension_numbers = #tpu.dot_dimension_numbers<[1], [0], [0], [1], [0, 0, 1, 1], [], []>} : vector<8x128xbf16>, vector<128x128xbf16>, vector<8x128xf32> -> vector<8x128xf32>
    %c0_15 = arith.constant 0 : index
    %c0_16 = arith.constant 0 : index
    %20 = vector.load %arg7[%c0_15, %c0_16] : memref<1x128xf32, #tpu.memory_space<vmem>>, vector<1x128xf32>
    %21 = vector.broadcast %20 : vector<1x128xf32> to vector<8x128xf32>
    %22 = arith.addf %19, %21 : vector<8x128xf32>
    %cst_17 = arith.constant 0.000000e+00 : f32
    %23 = vector.broadcast %cst_17 : f32 to vector<8x128xf32>
    %24 = arith.maximumf %22, %23 : vector<8x128xf32>
    %25 = arith.truncf %24 : vector<8x128xf32> to vector<8x128xbf16>
    %c0_18 = arith.constant 0 : index
    %c0_19 = arith.constant 0 : index
    %26 = vector.load %arg8[%c0_18, %c0_19] : memref<128x128xbf16, #tpu.memory_space<vmem>>, vector<128x128xbf16>
    %cst_20 = arith.constant dense<0.000000e+00> : vector<8x128xf32>
    %27 = tpu.matmul %25, %26, %cst_20 {dimension_numbers = #tpu.dot_dimension_numbers<[1], [0], [0], [1], [0, 0, 1, 1], [], []>} : vector<8x128xbf16>, vector<128x128xbf16>, vector<8x128xf32> -> vector<8x128xf32>
    %c0_21 = arith.constant 0 : index
    %c0_22 = arith.constant 0 : index
    %28 = vector.load %arg9[%c0_21, %c0_22] : memref<1x128xf32, #tpu.memory_space<vmem>>, vector<1x128xf32>
    %29 = vector.broadcast %28 : vector<1x128xf32> to vector<8x128xf32>
    %30 = arith.addf %27, %29 : vector<8x128xf32>
    %c0_23 = arith.constant 0 : index
    %c0_24 = arith.constant 0 : index
    %31 = vector.load %arg10[%c0_23, %c0_24] : memref<8x128xf32, #tpu.memory_space<vmem>>, vector<8x128xf32>
    tpu.vector_store %arg10[%c0_23, %c0_24], %30 {strides = array<i32>} : memref<8x128xf32, #tpu.memory_space<vmem>>, vector<8x128xf32>,
    return
  }
  func.func @transform_0(%arg0: i32) -> (i32, i32) {
    %c0_i32 = arith.constant 0 : i32
    %c0_i32_0 = arith.constant 0 : i32
    return %arg0, %c0_i32 : i32, i32
  }
  func.func @transform_1(%arg0: i32) -> (i32, i32) {
    %c0_i32 = arith.constant 0 : i32
    %c0_i32_0 = arith.constant 0 : i32
    %c0_i32_1 = arith.constant 0 : i32
    return %c0_i32, %c0_i32_0 : i32, i32
  }
  func.func @transform_2(%arg0: i32) -> (i32, i32) {
    %c0_i32 = arith.constant 0 : i32
    %c0_i32_0 = arith.constant 0 : i32
    %c0_i32_1 = arith.constant 0 : i32
    return %c0_i32, %c0_i32_0 : i32, i32
  }
  func.func @transform_3(%arg0: i32) -> (i32, i32) {
    %c0_i32 = arith.constant 0 : i32
    %c0_i32_0 = arith.constant 0 : i32
    %c0_i32_1 = arith.constant 0 : i32
    return %c0_i32, %c0_i32_0 : i32, i32
  }
  func.func @transform_4(%arg0: i32) -> (i32, i32) {
    %c0_i32 = arith.constant 0 : i32
    %c0_i32_0 = arith.constant 0 : i32
    %c0_i32_1 = arith.constant 0 : i32
    return %c0_i32, %c0_i32_0 : i32, i32
  }
  func.func @transform_5(%arg0: i32) -> (i32, i32) {
    %c0_i32 = arith.constant 0 : i32
    %c0_i32_0 = arith.constant 0 : i32
    %c0_i32_1 = arith.constant 0 : i32
    return %c0_i32, %c0_i32_0 : i32, i32
  }
  func.func @transform_6(%arg0: i32) -> (i32, i32) {
    %c0_i32 = arith.constant 0 : i32
    %c0_i32_0 = arith.constant 0 : i32
    %c0_i32_1 = arith.constant 0 : i32
    return %c0_i32, %c0_i32_0 : i32, i32
  }
  func.func @transform_7(%arg0: i32) -> (i32, i32) {
    %c0_i32 = arith.constant 0 : i32
    %c0_i32_0 = arith.constant 0 : i32
    %c0_i32_1 = arith.constant 0 : i32
    return %c0_i32, %c0_i32_0 : i32, i32
  }
  func.func @transform_8(%arg0: i32) -> (i32, i32) {
    %c0_i32 = arith.constant 0 : i32
    %c0_i32_0 = arith.constant 0 : i32
    %c0_i32_1 = arith.constant 0 : i32
    return %c0_i32, %c0_i32_0 : i32, i32
  }
  func.func @transform_9(%arg0: i32) -> (i32, i32) {
    %c0_i32 = arith.constant 0 : i32
    %c0_i32_0 = arith.constant 0 : i32
    return %arg0, %c0_i32 : i32, i32
  }
}

module attributes {stable_mosaic.version = 11 : i64} {
  func.func @_mlp_kernel(%arg0: i32, %arg1: memref<8x200xf32, #tpu.memory_space<vmem>>, %arg2: memref<200x128xbf16, #tpu.memory_space<vmem>>, %arg3: memref<1x128xf32, #tpu.memory_space<vmem>>, %arg4: memref<128x128xbf16, #tpu.memory_space<vmem>>, %arg5: memref<1x128xf32, #tpu.memory_space<vmem>>, %arg6: memref<128x128xbf16, #tpu.memory_space<vmem>>, %arg7: memref<1x128xf32, #tpu.memory_space<vmem>>, %arg8: memref<128x128xbf16, #tpu.memory_space<vmem>>, %arg9: memref<1x128xf32, #tpu.memory_space<vmem>>, %arg10: memref<8x128xf32, #tpu.memory_space<vmem>>) attributes {dimension_semantics = [#tpu.dimension_semantics<parallel>], iteration_bounds = array<i64: 1>, scalar_prefetch = 0 : i64, scratch_operands = 0 : i64, tpu.core_type = #tpu.core_type<tc>, window_params = [{transform_indices = @transform_0, window_bounds = array<i64: 8, 200>}, {pipeline_mode = #tpu.pipeline_mode<synchronous>, transform_indices = @transform_1, window_bounds = array<i64: 200, 128>}, {pipeline_mode = #tpu.pipeline_mode<synchronous>, transform_indices = @transform_2, window_bounds = array<i64: 1, 128>}, {pipeline_mode = #tpu.pipeline_mode<synchronous>, transform_indices = @transform_3, window_bounds = array<i64: 128, 128>}, {pipeline_mode = #tpu.pipeline_mode<synchronous>, transform_indices = @transform_4, window_bounds = array<i64: 1, 128>}, {pipeline_mode = #tpu.pipeline_mode<synchronous>, transform_indices = @transform_5, window_bounds = array<i64: 128, 128>}, {pipeline_mode = #tpu.pipeline_mode<synchronous>, transform_indices = @transform_6, window_bounds = array<i64: 1, 128>}, {pipeline_mode = #tpu.pipeline_mode<synchronous>, transform_indices = @transform_7, window_bounds = array<i64: 128, 128>}, {pipeline_mode = #tpu.pipeline_mode<synchronous>, transform_indices = @transform_8, window_bounds = array<i64: 1, 128>}, {transform_indices = @transform_9, window_bounds = array<i64: 8, 128>}]} {
    %c0 = arith.constant 0 : index
    %c0_0 = arith.constant 0 : index
    %0 = vector.load %arg1[%c0, %c0_0] : memref<8x200xf32, #tpu.memory_space<vmem>>, vector<8x200xf32>
    %1 = arith.truncf %0 : vector<8x200xf32> to vector<8x200xbf16>
    %c0_1 = arith.constant 0 : index
    %c0_2 = arith.constant 0 : index
    %2 = vector.load %arg2[%c0_1, %c0_2] : memref<200x128xbf16, #tpu.memory_space<vmem>>, vector<200x128xbf16>
    %cst = arith.constant dense<0.000000e+00> : vector<8x128xf32>
    %3 = tpu.matmul %1, %2, %cst {dimension_numbers = #tpu.dot_dimension_numbers<[1], [0], [0], [1], [0, 0, 1, 1], [], []>} : vector<8x200xbf16>, vector<200x128xbf16>, vector<8x128xf32> -> vector<8x128xf32>
    %c0_3 = arith.constant 0 : index
    %c0_4 = arith.constant 0 : index
    %4 = vector.load %arg3[%c0_3, %c0_4] : memref<1x128xf32, #tpu.memory_space<vmem>>, vector<1x128xf32>
    %5 = vector.broadcast %4 : vector<1x128xf32> to vector<8x128xf32>
    %6 = arith.addf %3, %5 : vector<8x128xf32>
    %cst_5 = arith.constant 0.000000e+00 : f32
    %7 = vector.broadcast %cst_5 : f32 to vector<8x128xf32>
    %8 = arith.maximumf %6, %7 : vector<8x128xf32>
    %9 = arith.truncf %8 : vector<8x128xf32> to vector<8x128xbf16>
    %c0_6 = arith.constant 0 : index
    %c0_7 = arith.constant 0 : index
    %10 = vector.load %arg4[%c0_6, %c0_7] : memref<128x128xbf16, #tpu.memory_space<vmem>>, vector<128x128xbf16>
    %cst_8 = arith.constant dense<0.000000e+00> : vector<8x128xf32>
    %11 = tpu.matmul %9, %10, %cst_8 {dimension_numbers = #tpu.dot_dimension_numbers<[1], [0], [0], [1], [0, 0, 1, 1], [], []>} : vector<8x128xbf16>, vector<128x128xbf16>, vector<8x128xf32> -> vector<8x128xf32>
    %c0_9 = arith.constant 0 : index
    %c0_10 = arith.constant 0 : index
    %12 = vector.load %arg5[%c0_9, %c0_10] : memref<1x128xf32, #tpu.memory_space<vmem>>, vector<1x128xf32>
    %13 = vector.broadcast %12 : vector<1x128xf32> to vector<8x128xf32>
    %14 = arith.addf %11, %13 : vector<8x128xf32>
    %cst_11 = arith.constant 0.000000e+00 : f32
    %15 = vector.broadcast %cst_11 : f32 to vector<8x128xf32>
    %16 = arith.maximumf %14, %15 : vector<8x128xf32>
    %17 = arith.truncf %16 : vector<8x128xf32> to vector<8x128xbf16>
    %c0_12 = arith.constant 0 : index
    %c0_13 = arith.constant 0 : index
    %18 = vector.load %arg6[%c0_12, %c0_13] : memref<128x128xbf16, #tpu.memory_space<vmem>>, vector<128x128xbf16>
    %cst_14 = arith.constant dense<0.000000e+00> : vector<8x128xf32>
    %19 = tpu.matmul %17, %18, %cst_14 {dimension_numbers = #tpu.dot_dimension_numbers<[1], [0], [0], [1], [0, 0, 1, 1], [], []>} : vector<8x128xbf16>, vector<128x128xbf16>, vector<8x128xf32> -> vector<8x128xf32>
    %c0_15 = arith.constant 0 : index
    %c0_16 = arith.constant 0 : index
    %20 = vector.load %arg7[%c0_15, %c0_16] : memref<1x128xf32, #tpu.memory_space<vmem>>, vector<1x128xf32>
    %21 = vector.broadcast %20 : vector<1x128xf32> to vector<8x128xf32>
    %22 = arith.addf %19, %21 : vector<8x128xf32>
    %cst_17 = arith.constant 0.000000e+00 : f32
    %23 = vector.broadcast %cst_17 : f32 to vector<8x128xf32>
    %24 = arith.maximumf %22, %23 : vector<8x128xf32>
    %25 = arith.truncf %24 : vector<8x128xf32> to vector<8x128xbf16>
    %c0_18 = arith.constant 0 : index
    %c0_19 = arith.constant 0 : index
    %26 = vector.load %arg8[%c0_18, %c0_19] : memref<128x128xbf16, #tpu.memory_space<vmem>>, vector<128x128xbf16>
    %cst_20 = arith.constant dense<0.000000e+00> : vector<8x128xf32>
    %27 = tpu.matmul %25, %26, %cst_20 {dimension_numbers = #tpu.dot_dimension_numbers<[1], [0], [0], [1], [0, 0, 1, 1], [], []>} : vector<8x128xbf16>, vector<128x128xbf16>, vector<8x128xf32> -> vector<8x128xf32>
    %c0_21 = arith.constant 0 : index
    %c0_22 = arith.constant 0 : index
    %28 = vector.load %arg9[%c0_21, %c0_22] : memref<1x128xf32, #tpu.memory_space<vmem>>, vector<1x128xf32>
    %29 = vector.broadcast %28 : vector<1x128xf32> to vector<8x128xf32>
    %30 = arith.addf %27, %29 : vector<8x128xf32>
    %c0_23 = arith.constant 0 : index
    %c0_24 = arith.constant 0 : index
    %31 = vector.load %arg10[%c0_23, %c0_24] : memref<8x128xf32, #tpu.memory_space<vmem>>, vector<8x128xf32>
    tpu.vector_store %arg10[%c0_23, %c0_24], %30 {strides = array<i32>} : memref<8x128xf32, #tpu.memory_space<vmem>>, vector<8x128xf32>,
    return
  }
  func.func @transform_0(%arg0: i32) -> (i32, i32) {
    %c0_i32 = arith.constant 0 : i32
    %c0_i32_0 = arith.constant 0 : i32
    return %arg0, %c0_i32 : i32, i32
  }
  func.func @transform_1(%arg0: i32) -> (i32, i32) {
    %c0_i32 = arith.constant 0 : i32
    %c0_i32_0 = arith.constant 0 : i32
    %c0_i32_1 = arith.constant 0 : i32
    return %c0_i32, %c0_i32_0 : i32, i32
  }
  func.func @transform_2(%arg0: i32) -> (i32, i32) {
    %c0_i32 = arith.constant 0 : i32
    %c0_i32_0 = arith.constant 0 : i32
    %c0_i32_1 = arith.constant 0 : i32
    return %c0_i32, %c0_i32_0 : i32, i32
  }
  func.func @transform_3(%arg0: i32) -> (i32, i32) {
    %c0_i32 = arith.constant 0 : i32
    %c0_i32_0 = arith.constant 0 : i32
    %c0_i32_1 = arith.constant 0 : i32
    return %c0_i32, %c0_i32_0 : i32, i32
  }
  func.func @transform_4(%arg0: i32) -> (i32, i32) {
    %c0_i32 = arith.constant 0 : i32
    %c0_i32_0 = arith.constant 0 : i32
    %c0_i32_1 = arith.constant 0 : i32
    return %c0_i32, %c0_i32_0 : i32, i32
  }
  func.func @transform_5(%arg0: i32) -> (i32, i32) {
    %c0_i32 = arith.constant 0 : i32
    %c0_i32_0 = arith.constant 0 : i32
    %c0_i32_1 = arith.constant 0 : i32
    return %c0_i32, %c0_i32_0 : i32, i32
  }
  func.func @transform_6(%arg0: i32) -> (i32, i32) {
    %c0_i32 = arith.constant 0 : i32
    %c0_i32_0 = arith.constant 0 : i32
    %c0_i32_1 = arith.constant 0 : i32
    return %c0_i32, %c0_i32_0 : i32, i32
  }
  func.func @transform_7(%arg0: i32) -> (i32, i32) {
    %c0_i32 = arith.constant 0 : i32
    %c0_i32_0 = arith.constant 0 : i32
    %c0_i32_1 = arith.constant 0 : i32
    return %c0_i32, %c0_i32_0 : i32, i32
  }
  func.func @transform_8(%arg0: i32) -> (i32, i32) {
    %c0_i32 = arith.constant 0 : i32
    %c0_i32_0 = arith.constant 0 : i32
    %c0_i32_1 = arith.constant 0 : i32
    return %c0_i32, %c0_i32_0 : i32, i32
  }
  func.func @transform_9(%arg0: i32) -> (i32, i32) {
    %c0_i32 = arith.constant 0 : i32
    %c0_i32_0 = arith.constant 0 : i32
    return %arg0, %c0_i32 : i32, i32
  }
}

</mosaic_0001>

<bundles_post_ra>
// kernel: tpu_custom_call.1
= control target key start
LH: loop header
LB: loop body
LE: loop exit
PB: predicated region body
PF: predicated region fallthrough
CT: control target
= control target key end

     0   :  { %14 = vsyncpa [#allocation3], 0  ;;  %s1065_s0 = inlined_call_operand.hbm [shape: f32[8,200], index: 0, kind: input, shape index: {}]   ;;  %s1066_s1 = inlined_call_operand.hbm [shape: bf16[200,128], index: 1, kind: input, shape index: {}]   ;;  %s1067_s2 = inlined_call_operand.vmem [shape: f32[1,128], index: 2, kind: input, shape index: {}]   ;;  %s1068_s3 = inlined_call_operand.hbm [shape: bf16[128,128], index: 3, kind: input, shape index: {}]   ;;  %s1069_s4 = inlined_call_operand.vmem [shape: f32[1,128], index: 4, kind: input, shape index: {}]   ;;  %s1070_s5 = inlined_call_operand.hbm [shape: bf16[128,128], index: 5, kind: input, shape index: {}]   ;;  %s1071_s6 = inlined_call_operand.vmem [shape: f32[1,128], index: 6, kind: input, shape index: {}]   ;;  %s1072_s7 = inlined_call_operand.hbm [shape: bf16[128,128], index: 7, kind: input, shape index: {}]   ;;  %s1073_s8 = inlined_call_operand.vmem [shape: f32[1,128], index: 8, kind: input, shape index: {}]   ;;  %s1074_s9 = inlined_call_operand.hbm [shape: f32[8,128], index: 9, kind: output, shape index: {}]  }
   0x1   :  { %15 = vsyncpa [#allocation6], 0 }
   0x2   :  { %16 = vsyncpa [#allocation9], 0 }
   0x3   :  { %17 = vsyncpa [#allocation4], 0  ;;  %s921_s30 = smov [#allocation5]  }
   0x4   :  { %s33_s10 = sshll.u32 %s921_s30, 4  ;;  %s34_s10 = int_to_ptr.vmem [resolvable:$true] %s33_s10 }
   0x5   :  { %s801_s11 = scalar_lea.vmem %s34_s10, 1600  ;;  %p806_p1 = scmp.lt.s32.totalorder %s34_s10, %s34_s10 }
   0x6   :  { %p802_p0 = scmp.ne.s32.totalorder %s34_s10, %s801_s11  ;;  %p807_p2 = scmp.lt.s32.totalorder %s801_s11, %s801_s11 }
   0x8   :  { %p808_p3 = por %p807_p2, %p806_p1 }
   0xa   :  { %p809_p4 = pnand %p808_p3, %p802_p0 }
   0xc   :  { %812 = shalt.err (!%p809_p4)
}
   0xd   :  { %s922_s12 = smov 64   ;;  %s923_s13 = smov 4  }
   0xe   :  { %39 = dma.hbm_to_vmem [thread:$0]  %s1066_s1, 1600, %s34_s10, [#allocation6], %s922_s12, %s922_s12, %s923_s13  }
   0xf   :  { %s924_s16 = smov [#allocation8]   ;;  %s925_s18 = smov [#allocation2]  }
  0x10   :  { %s61_s17 = sshll.u32 %s924_s16, 4  ;;  %s24_s19 = sshll.u32 %s925_s18, 4  ;;  %s62_s17 = int_to_ptr.vmem [resolvable:$true] %s61_s17  ;;  %s25_s19 = int_to_ptr.vmem [resolvable:$true] %s24_s19 }
  0x11   :  { %s821_s20 = scalar_lea.vmem %s62_s17, 1024  ;;  %p826_p6 = scmp.lt.s32.totalorder %s62_s17, %s62_s17 }
  0x12   :  { %p822_p5 = scmp.ne.s32.totalorder %s62_s17, %s821_s20  ;;  %p827_p7 = scmp.lt.s32.totalorder %s821_s20, %s821_s20 }
  0x14   :  { %p828_p8 = por %p827_p7, %p826_p6 }
  0x16   :  { %p829_p9 = pnand %p828_p8, %p822_p5 }
  0x18   :  { %832 = shalt.err (!%p829_p9)
}
  0x19   :  { %67 = dma.hbm_to_vmem [thread:$0]  %s1070_s5, 1024, %s62_s17, [#allocation9], %s922_s12, %s922_s12, %s923_s13  }
  0x1a   :  { %s841_s1 = scalar_lea.vmem %s25_s19, 256  ;;  %p846_p11 = scmp.lt.s32.totalorder %s25_s19, %s25_s19 }
  0x1b   :  { %p842_p10 = scmp.ne.s32.totalorder %s25_s19, %s841_s1  ;;  %p847_p12 = scmp.lt.s32.totalorder %s841_s1, %s841_s1 }
  0x1d   :  { %p848_p13 = por %p847_p12, %p846_p11 }
  0x1f   :  { %p849_p0 = pnand %p848_p13, %p842_p10 }
  0x21   :  { %852 = shalt.err (!%p849_p0)
}
  0x22   :  { %27 = dma.hbm_to_vmem [thread:$0]  %s1065_s0, 256, %s25_s19, [#allocation3]  }
  0x23   :  { %s926_s25 = smov [#allocation7]   ;;  %s927_s27 = smov [#allocation10]  }
  0x24   :  { %s47_s26 = sshll.u32 %s926_s25, 4  ;;  %s75_s28 = sshll.u32 %s927_s27, 4  ;;  %s48_s26 = int_to_ptr.vmem [resolvable:$true] %s47_s26  ;;  %s76_s28 = int_to_ptr.vmem [resolvable:$true] %s75_s28 }
  0x25   :  { %s861_s29 = scalar_lea.vmem %s48_s26, 1024  ;;  %p866_p2 = scmp.lt.s32.totalorder %s48_s26, %s48_s26 }
  0x26   :  { %p862_p1 = scmp.ne.s32.totalorder %s48_s26, %s861_s29  ;;  %p867_p3 = scmp.lt.s32.totalorder %s861_s29, %s861_s29 }
  0x28   :  { %p868_p4 = por %p867_p3, %p866_p2 }
  0x2a   :  { %p869_p5 = pnand %p868_p4, %p862_p1 }
  0x2c   :  { %872 = shalt.err (!%p869_p5)
}
  0x2d   :  { %53 = dma.hbm_to_vmem [thread:$0]  %s1068_s3, 1024, %s48_s26, [#allocation6], %s922_s12, %s922_s12, %s923_s13  }
  0x2e   :  { %s881_s0 = scalar_lea.vmem %s76_s28, 1024  ;;  %p886_p7 = scmp.lt.s32.totalorder %s76_s28, %s76_s28 }
  0x2f   :  { %p882_p6 = scmp.ne.s32.totalorder %s76_s28, %s881_s0  ;;  %p887_p8 = scmp.lt.s32.totalorder %s881_s0, %s881_s0 }
  0x31   :  { %p888_p9 = por %p887_p8, %p886_p7 }
  0x33   :  { %p889_p10 = pnand %p888_p9, %p882_p6 }
  0x35   :  { %892 = shalt.err (!%p889_p10)
}
  0x36   :  { %81 = dma.hbm_to_vmem [thread:$0]  %s1072_s7, 1024, %s76_s28, [#allocation9], %s922_s12, %s922_s12, %s923_s13  }
  0x37   :  { %913 = dma.done.wait [#allocation3], 256  }
  0x38   :  { %914 = vsyncadd [#allocation3], 4294967040 }
  0x39   :  { %915 = dma.done.wait [#allocation6], 2624  }
  0x3a   :  { %916 = vsyncadd [#allocation6], 4294964672 }
  0x3b   :  { %917 = dma.done.wait [#allocation9], 2048  }
  0x3c   :  { %918 = vsyncadd [#allocation9], 4294965248  ;;  %v928_v0 = vmov 0   ;;  %v929_v1 = vmov 0.0   ;;  %v756_v2 = vld [vmem:[#allocation5 + $0x38] sm:$0xff]   ;;  %v757_v3 = vld [vmem:[#allocation5 + $0x30] sm:$0xff]  }
  0x3d   :  { %219 = vmatprep.subr.bf16.mxu0 %v928_v0  ;;  %685 = vmatprep.subr.bf16.mxu1 %v929_v1  ;;  %v758_v4 = vld [vmem:[#allocation5 + $0x28] sm:$0xff]   ;;  %v759_v5 = vld [vmem:[#allocation5 + $0x20] sm:$0xff]   ;;  %v101_v6 = vld [vmem:[#allocation2 + $0x8] sm:$0xff]  ;;  %vm211_vm0 = vcmask 588800   ;;  %vm215_vm1 = vcmask 1043456   ;;  %vm930_vm2 = vmmov 0  }
  0x3e   :  { %220 = vmatpush1.bf16.msra.mxu0 %v756_v2  ;;  %v760_v7 = vld [vmem:[#allocation5 + $0x18] sm:$0xff]   ;;  %v103_v8 = vpack.c.bf16 %v101_v6, %v101_v6  ;;  %v761_v11 = vld [vmem:[#allocation5 + $0x10] sm:$0xff]   ;;  %v762_v13 = vld [vmem:[#allocation5 + $0x8] sm:$0xff]   ;;  %701 = vmatprep.mubr.msk.bf16.mxu1 %vm930_vm2, %v929_v1  ;;  %s931_s16 = smov [#allocation11]  }
  0x3f   :  { %221 = vmatprep.subr.bf16.mxu0 %v928_v0  ;;  %v769_v9 = vld [vmem:[#allocation7 + $0x38] sm:$0xff]   ;;  %v770_v10 = vld [vmem:[#allocation7 + $0x30] sm:$0xff]   ;;  %v771_v12 = vld [vmem:[#allocation7 + $0x28] sm:$0xff]   ;;  %s605_s17 = sshll.u32 %s931_s16, 4  ;;  %s606_s17 = int_to_ptr.vmem [resolvable:$true] %s605_s17 }
  0x40   :  { %630 = vmatprep.mubr.msk.bf16.mxu0 %vm211_vm0, %v103_v8  ;;  %686 = vmatpush3.bf16.msra.mxu1 %v769_v9  ;;  %v772_v14 = vld [vmem:[#allocation7 + $0x20] sm:$0xff]   ;;  %v764_v16 = vld [vmem:[#allocation5 + $0x60] ss:$0 sps:$4 sm:$0xff]   ;;  %v774_v19 = vld [vmem:[#allocation7 + $0x10] sm:$0xff]   ;;  %p898_p12 = scmp.lt.s32.totalorder %s606_s17, %s606_s17 }
  0x41   :  { %687 = vmatprep.subr.bf16.mxu1 %v929_v1  ;;  %v763_v15 = vld [vmem:[#allocation5] sm:$0xff]   ;;  %v217_v18 = vsel %vm215_vm1, %v764_v16, 0  ;;  %v765_v20 = vld [vmem:[#allocation5 + $0x58] sm:$0xff]   ;;  %v766_v21 = vld [vmem:[#allocation5 + $0x50] sm:$0xff]  }
  0x42   :  { %222 = vmatpush1.bf16.msra.mxu0 %v757_v3  ;;  %v773_v17 = vld [vmem:[#allocation7 + $0x18] sm:$0xff]   ;;  %v767_v22 = vld [vmem:[#allocation5 + $0x48] sm:$0xff]   ;;  %v100_v24 = vld [vmem:[#allocation2] sm:$0xff] }
  0x43   :  { %223 = vmatprep.subr.bf16.mxu0 %v928_v0  ;;  %v768_v23 = vld [vmem:[#allocation5 + $0x40] sm:$0xff]   ;;  %v102_v25 = vpack.c.bf16 %v100_v24, %v100_v24  ;;  %v775_v26 = vld [vmem:[#allocation7 + $0x8] sm:$0xff]   ;;  %v778_v37 = vld [vmem:[#allocation8 + $0x30] sm:$0xff]  }
  0x44   :  { %688 = vmatpush3.bf16.msra.mxu1 %v770_v10  ;;  %v776_v27 = vld [vmem:[#allocation7] sm:$0xff]   ;;  %v616_v28 = vld [vmem:[%s1067_s2] ss:$0 sm:$0xff]  ;;  %v777_v34 = vld [vmem:[#allocation8 + $0x38] sm:$0xff]  }
  0x45   :  { %689 = vmatprep.subr.bf16.mxu1 %v929_v1  ;;  %v779_v38 = vld [vmem:[#allocation8 + $0x28] sm:$0xff]   ;;  %v780_v39 = vld [vmem:[#allocation8 + $0x20] sm:$0xff]   ;;  %v781_v40 = vld [vmem:[#allocation8 + $0x18] sm:$0xff]  }
  0x46   :  { %224 = vmatpush1.bf16.msra.mxu0 %v758_v4  ;;  %v782_v41 = vld [vmem:[#allocation8 + $0x10] sm:$0xff]   ;;  %v783_v42 = vld [vmem:[#allocation8 + $0x8] sm:$0xff]   ;;  %v784_v43 = vld [vmem:[#allocation8] sm:$0xff]  }
  0x47   :  { %225 = vmatprep.subr.bf16.mxu0 %v928_v0  ;;  %v785_v44 = vld [vmem:[#allocation10 + $0x38] sm:$0xff]   ;;  %v786_v45 = vld [vmem:[#allocation10 + $0x30] sm:$0xff]   ;;  %v787_v46 = vld [vmem:[#allocation10 + $0x28] sm:$0xff]  }
  0x48   :  { %690 = vmatpush3.bf16.msra.mxu1 %v771_v12  ;;  %v788_v47 = vld [vmem:[#allocation10 + $0x20] sm:$0xff]   ;;  %v789_v48 = vld [vmem:[#allocation10 + $0x18] sm:$0xff]   ;;  %v790_v49 = vld [vmem:[#allocation10 + $0x10] sm:$0xff]  }
  0x49   :  { %691 = vmatprep.subr.bf16.mxu1 %v929_v1  ;;  %v631_v50 = vld [vmem:[%s1069_s4] ss:$0 sm:$0xff]  ;;  %v792_v59 = vld [vmem:[#allocation10] sm:$0xff]  }
  0x4a   :  { %226 = vmatpush1.bf16.msra.mxu0 %v759_v5  ;;  %v791_v58 = vld [vmem:[#allocation10 + $0x8] sm:$0xff]  }
  0x4b   :  { %227 = vmatprep.subr.bf16.mxu0 %v928_v0  ;;  %v640_v60 = vld [vmem:[%s1071_s6] ss:$0 sm:$0xff]  ;;  %s893_s6 = scalar_lea.vmem %s606_s17, 128 }
  0x4c   :  { %692 = vmatpush3.bf16.msra.mxu1 %v772_v14  ;;  %v649_v5 = vld [vmem:[%s1073_s8] ss:$0 sm:$0xff]  ;;  %p894_p11 = scmp.ne.s32.totalorder %s606_s17, %s893_s6  ;;  %p899_p13 = scmp.lt.s32.totalorder %s893_s6, %s893_s6 }
  0x4d   :  { %693 = vmatprep.subr.bf16.mxu1 %v929_v1 }
  0x4e   :  { %228 = vmatpush1.bf16.msra.mxu0 %v760_v7  ;;  %p900_p0 = por %p899_p13, %p898_p12 }
  0x4f   :  { %229 = vmatprep.subr.bf16.mxu0 %v928_v0 }
  0x50   :  { %694 = vmatpush3.bf16.msra.mxu1 %v773_v17  ;;  %p901_p1 = pnand %p900_p0, %p894_p11 }
  0x51   :  { %695 = vmatprep.subr.bf16.mxu1 %v929_v1 }
  0x52   :  { %230 = vmatpush1.bf16.msra.mxu0 %v761_v11 }
  0x53   :  { %231 = vmatprep.subr.bf16.mxu0 %v928_v0 }
  0x54   :  { %696 = vmatpush3.bf16.msra.mxu1 %v774_v19 }
  0x55   :  { %697 = vmatprep.subr.bf16.mxu1 %v929_v1 }
  0x56   :  { %232 = vmatpush1.bf16.msra.mxu0 %v762_v13 }
  0x57   :  { %233 = vmatprep.subr.bf16.mxu0 %v928_v0 }
  0x58   :  { %698 = vmatpush3.bf16.msra.mxu1 %v775_v26 }
  0x59   :  { %699 = vmatprep.subr.bf16.mxu1 %v929_v1 }
  0x5a   :  { %234 = vmatpush1.bf16.msra.mxu0 %v763_v15 }
  0x5b   :  { %241 = vmatprep.subr.bf16.mxu0 %v928_v0 }
  0x5c   :  { %700 = vmatpush3.bf16.msra.mxu1 %v776_v27 }
  0x5d   :  { %705 = vmatprep.subr.bf16.mxu1 %v929_v1 }
  0x5e   :  { %242 = vmatpush2.bf16.msra.mxu0 %v217_v18 }
  0x5f   :  { %243 = vmatprep.subr.bf16.mxu0 %v928_v0 }
  0x62   :  { %244 = vmatpush2.bf16.msra.mxu0 %v765_v20 }
  0x63   :  { %245 = vmatprep.subr.bf16.mxu0 %v928_v0 }
  0x66   :  { %246 = vmatpush2.bf16.msra.mxu0 %v766_v21 }
  0x67   :  { %247 = vmatprep.subr.bf16.mxu0 %v928_v0 }
  0x6a   :  { %248 = vmatpush2.bf16.msra.mxu0 %v767_v22 }
  0x6b   :  { %249 = vmatprep.subr.bf16.mxu0 %v928_v0 }
  0x6e   :  { %250 = vmatpush2.bf16.msra.mxu0 %v768_v23 }
  0x6f   :  { %725 = vmatprep.subr.bf16.mxu0 %v929_v1 }
  0x71   :  { %252 = vmatmul.mubr.bf16.vlgmr.msra.gmra.mxu0 %v102_v25 }
  0x72   :  { %741 = vmatprep.mubr.msk.bf16.mxu0 %vm930_vm2, %v929_v1  ;;  %726 = vmatpush3.bf16.msra.mxu0 %v785_v44 }
  0x73   :  { %727 = vmatprep.subr.bf16.mxu0 %v929_v1 }
  0x76   :  { %728 = vmatpush3.bf16.msra.mxu0 %v786_v45 }
  0x77   :  { %729 = vmatprep.subr.bf16.mxu0 %v929_v1 }
  0x7a   :  { %730 = vmatpush3.bf16.msra.mxu0 %v787_v46 }
  0x7b   :  { %731 = vmatprep.subr.bf16.mxu0 %v929_v1 }
  0x7e   :  { %732 = vmatpush3.bf16.msra.mxu0 %v788_v47 }
  0x7f   :  { %733 = vmatprep.subr.bf16.mxu0 %v929_v1 }
  0x82   :  { %734 = vmatpush3.bf16.msra.mxu0 %v789_v48 }
  0x83   :  { %735 = vmatprep.subr.bf16.mxu0 %v929_v1 }
  0x86   :  { %736 = vmatpush3.bf16.msra.mxu0 %v790_v49 }
  0x87   :  { %737 = vmatprep.subr.bf16.mxu0 %v929_v1 }
  0x8a   :  { %738 = vmatpush3.bf16.msra.mxu0 %v791_v58 }
  0x8b   :  { %739 = vmatprep.subr.bf16.mxu0 %v929_v1 }
  0x8e   :  { %740 = vmatpush3.bf16.msra.mxu0 %v792_v59 }
 0x131   :  { %v253_v29 = vpop.f32.mrf.mxu0 }
 0x132   :  { %v254_v30 = vadd.f32 %v616_v28, %v253_v29 }
 0x133   :  { %v255_v31 = vpop.f32.mrf.mxu0 }
 0x134   :  { %v259_v32 = vmax.f32 %v254_v30, 0.0 }
 0x135   :  { %v256_v33 = vpop.f32.mrf.mxu0 }
 0x136   :  { %v260_v35 = vpack.c.bf16 %v259_v32, %v259_v32 }
 0x137   :  { %v257_v36 = vpop.f32.mrf.mxu0 }
 0x138   :  { %702 = vmatmul.mubr.bf16.vlgmr.msra.gmra.mxu1 %v260_v35 }
 0x139   :  { %706 = vmatpush3.bf16.msra.mxu1 %v777_v34  ;;  %721 = vmatprep.mubr.msk.bf16.mxu1 %vm930_vm2, %v929_v1 }
 0x13a   :  { %707 = vmatprep.subr.bf16.mxu1 %v929_v1 }
 0x13d   :  { %708 = vmatpush3.bf16.msra.mxu1 %v778_v37 }
 0x13e   :  { %709 = vmatprep.subr.bf16.mxu1 %v929_v1 }
 0x141   :  { %710 = vmatpush3.bf16.msra.mxu1 %v779_v38 }
 0x142   :  { %711 = vmatprep.subr.bf16.mxu1 %v929_v1 }
 0x145   :  { %712 = vmatpush3.bf16.msra.mxu1 %v780_v39 }
 0x146   :  { %713 = vmatprep.subr.bf16.mxu1 %v929_v1 }
 0x149   :  { %714 = vmatpush3.bf16.msra.mxu1 %v781_v40 }
 0x14a   :  { %715 = vmatprep.subr.bf16.mxu1 %v929_v1 }
 0x14d   :  { %716 = vmatpush3.bf16.msra.mxu1 %v782_v41 }
 0x14e   :  { %717 = vmatprep.subr.bf16.mxu1 %v929_v1 }
 0x151   :  { %718 = vmatpush3.bf16.msra.mxu1 %v783_v42 }
 0x152   :  { %719 = vmatprep.subr.bf16.mxu1 %v929_v1 }
 0x155   :  { %720 = vmatpush3.bf16.msra.mxu1 %v784_v43 }
 0x1f8   :  { %v366_v51 = vpop.f32.mrf.mxu1 }
 0x1f9   :  { %v367_v52 = vadd.f32 %v631_v50, %v366_v51 }
 0x1fa   :  { %v703_v53 = vpop.f32.mrf.mxu1 }
 0x1fb   :  { %v372_v54 = vmax.f32 %v367_v52, 0.0 }
 0x1fc   :  { %v369_v55 = vpop.f32.mrf.mxu1 }
 0x1fd   :  { %v373_v56 = vpack.c.bf16 %v372_v54, %v372_v54 }
 0x1fe   :  { %v704_v57 = vpop.f32.mrf.mxu1 }
 0x1ff   :  { %722 = vmatmul.mubr.bf16.vlgmr.msra.gmra.mxu1 %v373_v56 }
 0x2bf   :  { %v479_v61 = vpop.f32.mrf.mxu1 }
 0x2c0   :  { %v480_v62 = vadd.f32 %v640_v60, %v479_v61 }
 0x2c1   :  { %v723_v63 = vpop.f32.mrf.mxu1 }
 0x2c2   :  { %v485_v0 = vmax.f32 %v480_v62, 0.0 }
 0x2c3   :  { %v482_v2 = vpop.f32.mrf.mxu1 }
 0x2c4   :  { %v486_v3 = vpack.c.bf16 %v485_v0, %v485_v0 }
 0x2c5   :  { %v724_v4 = vpop.f32.mrf.mxu1 }
 0x2c6   :  { %742 = vmatmul.mubr.bf16.vlgmr.msra.gmra.mxu0 %v486_v3 }
 0x386   :  { %v592_v1 = vpop.f32.mrf.mxu0 }
 0x387   :  { %v593_v6 = vadd.f32 %v649_v5, %v592_v1 }
 0x388   :  { %v743_v7 = vpop.f32.mrf.mxu0 }
 0x389   :  { %598 = vst [vmem:[#allocation11] sm:$0xff] %v593_v6 }
 0x38a   :  { %v595_v8 = vpop.f32.mrf.mxu0 }
 0x38b   :  { %904 = shalt.err (!%p901_p1)
}
 0x38c   :  { %608 = dma.vmem_to_hbm [thread:$0]  %s606_s17, 128, %s1074_s9, [#allocation4]   ;;  %v744_v9 = vpop.f32.mrf.mxu0 }
 0x38d   :  { %919 = dma.done.wait [#allocation4], 128  }
 0x38e   :  { %920 = vsyncadd [#allocation4], 4294967168 }
 0x38f   :  { %612 = vsyncpa [#allocation3], 1 }
 0x390   :  { %613 = vsyncpa [#allocation6], 1 }
 0x391   :  { %614 = vsyncpa [#allocation9], 1 }
 0x392   :  { %615 = vsyncpa [#allocation4], 1 }

// kernel: tpu_custom_call.1
= control target key start
LH: loop header
LB: loop body
LE: loop exit
PB: predicated region body
PF: predicated region fallthrough
CT: control target
= control target key end

     0   :  { %14 = vsyncpa [#allocation3], 0  ;;  %s1065_s0 = inlined_call_operand.hbm [shape: f32[8,200], index: 0, kind: input, shape index: {}]   ;;  %s1066_s1 = inlined_call_operand.hbm [shape: bf16[200,128], index: 1, kind: input, shape index: {}]   ;;  %s1067_s2 = inlined_call_operand.vmem [shape: f32[1,128], index: 2, kind: input, shape index: {}]   ;;  %s1068_s3 = inlined_call_operand.hbm [shape: bf16[128,128], index: 3, kind: input, shape index: {}]   ;;  %s1069_s4 = inlined_call_operand.vmem [shape: f32[1,128], index: 4, kind: input, shape index: {}]   ;;  %s1070_s5 = inlined_call_operand.hbm [shape: bf16[128,128], index: 5, kind: input, shape index: {}]   ;;  %s1071_s6 = inlined_call_operand.vmem [shape: f32[1,128], index: 6, kind: input, shape index: {}]   ;;  %s1072_s7 = inlined_call_operand.hbm [shape: bf16[128,128], index: 7, kind: input, shape index: {}]   ;;  %s1073_s8 = inlined_call_operand.vmem [shape: f32[1,128], index: 8, kind: input, shape index: {}]   ;;  %s1074_s9 = inlined_call_operand.hbm [shape: f32[8,128], index: 9, kind: output, shape index: {}]  }
   0x1   :  { %15 = vsyncpa [#allocation6], 0 }
   0x2   :  { %16 = vsyncpa [#allocation9], 0 }
   0x3   :  { %17 = vsyncpa [#allocation4], 0  ;;  %s921_s30 = smov [#allocation5]  }
   0x4   :  { %s33_s10 = sshll.u32 %s921_s30, 4  ;;  %s34_s10 = int_to_ptr.vmem [resolvable:$true] %s33_s10 }
   0x5   :  { %s801_s11 = scalar_lea.vmem %s34_s10, 1600  ;;  %p806_p1 = scmp.lt.s32.totalorder %s34_s10, %s34_s10 }
   0x6   :  { %p802_p0 = scmp.ne.s32.totalorder %s34_s10, %s801_s11  ;;  %p807_p2 = scmp.lt.s32.totalorder %s801_s11, %s801_s11 }
   0x8   :  { %p808_p3 = por %p807_p2, %p806_p1 }
   0xa   :  { %p809_p4 = pnand %p808_p3, %p802_p0 }
   0xc   :  { %812 = shalt.err (!%p809_p4)
}
   0xd   :  { %s922_s12 = smov 64   ;;  %s923_s13 = smov 4  }
   0xe   :  { %39 = dma.hbm_to_vmem [thread:$0]  %s1066_s1, 1600, %s34_s10, [#allocation6], %s922_s12, %s922_s12, %s923_s13  }
   0xf   :  { %s924_s16 = smov [#allocation8]   ;;  %s925_s18 = smov [#allocation2]  }
  0x10   :  { %s61_s17 = sshll.u32 %s924_s16, 4  ;;  %s24_s19 = sshll.u32 %s925_s18, 4  ;;  %s62_s17 = int_to_ptr.vmem [resolvable:$true] %s61_s17  ;;  %s25_s19 = int_to_ptr.vmem [resolvable:$true] %s24_s19 }
  0x11   :  { %s821_s20 = scalar_lea.vmem %s62_s17, 1024  ;;  %p826_p6 = scmp.lt.s32.totalorder %s62_s17, %s62_s17 }
  0x12   :  { %p822_p5 = scmp.ne.s32.totalorder %s62_s17, %s821_s20  ;;  %p827_p7 = scmp.lt.s32.totalorder %s821_s20, %s821_s20 }
  0x14   :  { %p828_p8 = por %p827_p7, %p826_p6 }
  0x16   :  { %p829_p9 = pnand %p828_p8, %p822_p5 }
  0x18   :  { %832 = shalt.err (!%p829_p9)
}
  0x19   :  { %67 = dma.hbm_to_vmem [thread:$0]  %s1070_s5, 1024, %s62_s17, [#allocation9], %s922_s12, %s922_s12, %s923_s13  }
  0x1a   :  { %s841_s1 = scalar_lea.vmem %s25_s19, 256  ;;  %p846_p11 = scmp.lt.s32.totalorder %s25_s19, %s25_s19 }
  0x1b   :  { %p842_p10 = scmp.ne.s32.totalorder %s25_s19, %s841_s1  ;;  %p847_p12 = scmp.lt.s32.totalorder %s841_s1, %s841_s1 }
  0x1d   :  { %p848_p13 = por %p847_p12, %p846_p11 }
  0x1f   :  { %p849_p0 = pnand %p848_p13, %p842_p10 }
  0x21   :  { %852 = shalt.err (!%p849_p0)
}
  0x22   :  { %27 = dma.hbm_to_vmem [thread:$0]  %s1065_s0, 256, %s25_s19, [#allocation3]  }
  0x23   :  { %s926_s25 = smov [#allocation7]   ;;  %s927_s27 = smov [#allocation10]  }
  0x24   :  { %s47_s26 = sshll.u32 %s926_s25, 4  ;;  %s75_s28 = sshll.u32 %s927_s27, 4  ;;  %s48_s26 = int_to_ptr.vmem [resolvable:$true] %s47_s26  ;;  %s76_s28 = int_to_ptr.vmem [resolvable:$true] %s75_s28 }
  0x25   :  { %s861_s29 = scalar_lea.vmem %s48_s26, 1024  ;;  %p866_p2 = scmp.lt.s32.totalorder %s48_s26, %s48_s26 }
  0x26   :  { %p862_p1 = scmp.ne.s32.totalorder %s48_s26, %s861_s29  ;;  %p867_p3 = scmp.lt.s32.totalorder %s861_s29, %s861_s29 }
  0x28   :  { %p868_p4 = por %p867_p3, %p866_p2 }
  0x2a   :  { %p869_p5 = pnand %p868_p4, %p862_p1 }
  0x2c   :  { %872 = shalt.err (!%p869_p5)
}
  0x2d   :  { %53 = dma.hbm_to_vmem [thread:$0]  %s1068_s3, 1024, %s48_s26, [#allocation6], %s922_s12, %s922_s12, %s923_s13  }
  0x2e   :  { %s881_s0 = scalar_lea.vmem %s76_s28, 1024  ;;  %p886_p7 = scmp.lt.s32.totalorder %s76_s28, %s76_s28 }
  0x2f   :  { %p882_p6 = scmp.ne.s32.totalorder %s76_s28, %s881_s0  ;;  %p887_p8 = scmp.lt.s32.totalorder %s881_s0, %s881_s0 }
  0x31   :  { %p888_p9 = por %p887_p8, %p886_p7 }
  0x33   :  { %p889_p10 = pnand %p888_p9, %p882_p6 }
  0x35   :  { %892 = shalt.err (!%p889_p10)
}
  0x36   :  { %81 = dma.hbm_to_vmem [thread:$0]  %s1072_s7, 1024, %s76_s28, [#allocation9], %s922_s12, %s922_s12, %s923_s13  }
  0x37   :  { %913 = dma.done.wait [#allocation3], 256  }
  0x38   :  { %914 = vsyncadd [#allocation3], 4294967040 }
  0x39   :  { %915 = dma.done.wait [#allocation6], 2624  }
  0x3a   :  { %916 = vsyncadd [#allocation6], 4294964672 }
  0x3b   :  { %917 = dma.done.wait [#allocation9], 2048  }
  0x3c   :  { %918 = vsyncadd [#allocation9], 4294965248  ;;  %v928_v0 = vmov 0   ;;  %v929_v1 = vmov 0.0   ;;  %v756_v2 = vld [vmem:[#allocation5 + $0x38] sm:$0xff]   ;;  %v757_v3 = vld [vmem:[#allocation5 + $0x30] sm:$0xff]  }
  0x3d   :  { %219 = vmatprep.subr.bf16.mxu0 %v928_v0  ;;  %685 = vmatprep.subr.bf16.mxu1 %v929_v1  ;;  %v758_v4 = vld [vmem:[#allocation5 + $0x28] sm:$0xff]   ;;  %v759_v5 = vld [vmem:[#allocation5 + $0x20] sm:$0xff]   ;;  %v101_v6 = vld [vmem:[#allocation2 + $0x8] sm:$0xff]  ;;  %vm211_vm0 = vcmask 588800   ;;  %vm215_vm1 = vcmask 1043456   ;;  %vm930_vm2 = vmmov 0  }
  0x3e   :  { %220 = vmatpush1.bf16.msra.mxu0 %v756_v2  ;;  %v760_v7 = vld [vmem:[#allocation5 + $0x18] sm:$0xff]   ;;  %v103_v8 = vpack.c.bf16 %v101_v6, %v101_v6  ;;  %v761_v11 = vld [vmem:[#allocation5 + $0x10] sm:$0xff]   ;;  %v762_v13 = vld [vmem:[#allocation5 + $0x8] sm:$0xff]   ;;  %701 = vmatprep.mubr.msk.bf16.mxu1 %vm930_vm2, %v929_v1  ;;  %s931_s16 = smov [#allocation11]  }
  0x3f   :  { %221 = vmatprep.subr.bf16.mxu0 %v928_v0  ;;  %v769_v9 = vld [vmem:[#allocation7 + $0x38] sm:$0xff]   ;;  %v770_v10 = vld [vmem:[#allocation7 + $0x30] sm:$0xff]   ;;  %v771_v12 = vld [vmem:[#allocation7 + $0x28] sm:$0xff]   ;;  %s605_s17 = sshll.u32 %s931_s16, 4  ;;  %s606_s17 = int_to_ptr.vmem [resolvable:$true] %s605_s17 }
  0x40   :  { %630 = vmatprep.mubr.msk.bf16.mxu0 %vm211_vm0, %v103_v8  ;;  %686 = vmatpush3.bf16.msra.mxu1 %v769_v9  ;;  %v772_v14 = vld [vmem:[#allocation7 + $0x20] sm:$0xff]   ;;  %v764_v16 = vld [vmem:[#allocation5 + $0x60] ss:$0 sps:$4 sm:$0xff]   ;;  %v774_v19 = vld [vmem:[#allocation7 + $0x10] sm:$0xff]   ;;  %p898_p12 = scmp.lt.s32.totalorder %s606_s17, %s606_s17 }
  0x41   :  { %687 = vmatprep.subr.bf16.mxu1 %v929_v1  ;;  %v763_v15 = vld [vmem:[#allocation5] sm:$0xff]   ;;  %v217_v18 = vsel %vm215_vm1, %v764_v16, 0  ;;  %v765_v20 = vld [vmem:[#allocation5 + $0x58] sm:$0xff]   ;;  %v766_v21 = vld [vmem:[#allocation5 + $0x50] sm:$0xff]  }
  0x42   :  { %222 = vmatpush1.bf16.msra.mxu0 %v757_v3  ;;  %v773_v17 = vld [vmem:[#allocation7 + $0x18] sm:$0xff]   ;;  %v767_v22 = vld [vmem:[#allocation5 + $0x48] sm:$0xff]   ;;  %v100_v24 = vld [vmem:[#allocation2] sm:$0xff] }
  0x43   :  { %223 = vmatprep.subr.bf16.mxu0 %v928_v0  ;;  %v768_v23 = vld [vmem:[#allocation5 + $0x40] sm:$0xff]   ;;  %v102_v25 = vpack.c.bf16 %v100_v24, %v100_v24  ;;  %v775_v26 = vld [vmem:[#allocation7 + $0x8] sm:$0xff]   ;;  %v778_v37 = vld [vmem:[#allocation8 + $0x30] sm:$0xff]  }
  0x44   :  { %688 = vmatpush3.bf16.msra.mxu1 %v770_v10  ;;  %v776_v27 = vld [vmem:[#allocation7] sm:$0xff]   ;;  %v616_v28 = vld [vmem:[%s1067_s2] ss:$0 sm:$0xff]  ;;  %v777_v34 = vld [vmem:[#allocation8 + $0x38] sm:$0xff]  }
  0x45   :  { %689 = vmatprep.subr.bf16.mxu1 %v929_v1  ;;  %v779_v38 = vld [vmem:[#allocation8 + $0x28] sm:$0xff]   ;;  %v780_v39 = vld [vmem:[#allocation8 + $0x20] sm:$0xff]   ;;  %v781_v40 = vld [vmem:[#allocation8 + $0x18] sm:$0xff]  }
  0x46   :  { %224 = vmatpush1.bf16.msra.mxu0 %v758_v4  ;;  %v782_v41 = vld [vmem:[#allocation8 + $0x10] sm:$0xff]   ;;  %v783_v42 = vld [vmem:[#allocation8 + $0x8] sm:$0xff]   ;;  %v784_v43 = vld [vmem:[#allocation8] sm:$0xff]  }
  0x47   :  { %225 = vmatprep.subr.bf16.mxu0 %v928_v0  ;;  %v785_v44 = vld [vmem:[#allocation10 + $0x38] sm:$0xff]   ;;  %v786_v45 = vld [vmem:[#allocation10 + $0x30] sm:$0xff]   ;;  %v787_v46 = vld [vmem:[#allocation10 + $0x28] sm:$0xff]  }
  0x48   :  { %690 = vmatpush3.bf16.msra.mxu1 %v771_v12  ;;  %v788_v47 = vld [vmem:[#allocation10 + $0x20] sm:$0xff]   ;;  %v789_v48 = vld [vmem:[#allocation10 + $0x18] sm:$0xff]   ;;  %v790_v49 = vld [vmem:[#allocation10 + $0x10] sm:$0xff]  }
  0x49   :  { %691 = vmatprep.subr.bf16.mxu1 %v929_v1  ;;  %v631_v50 = vld [vmem:[%s1069_s4] ss:$0 sm:$0xff]  ;;  %v792_v59 = vld [vmem:[#allocation10] sm:$0xff]  }
  0x4a   :  { %226 = vmatpush1.bf16.msra.mxu0 %v759_v5  ;;  %v791_v58 = vld [vmem:[#allocation10 + $0x8] sm:$0xff]  }
  0x4b   :  { %227 = vmatprep.subr.bf16.mxu0 %v928_v0  ;;  %v640_v60 = vld [vmem:[%s1071_s6] ss:$0 sm:$0xff]  ;;  %s893_s6 = scalar_lea.vmem %s606_s17, 128 }
  0x4c   :  { %692 = vmatpush3.bf16.msra.mxu1 %v772_v14  ;;  %v649_v5 = vld [vmem:[%s1073_s8] ss:$0 sm:$0xff]  ;;  %p894_p11 = scmp.ne.s32.totalorder %s606_s17, %s893_s6  ;;  %p899_p13 = scmp.lt.s32.totalorder %s893_s6, %s893_s6 }
  0x4d   :  { %693 = vmatprep.subr.bf16.mxu1 %v929_v1 }
  0x4e   :  { %228 = vmatpush1.bf16.msra.mxu0 %v760_v7  ;;  %p900_p0 = por %p899_p13, %p898_p12 }
  0x4f   :  { %229 = vmatprep.subr.bf16.mxu0 %v928_v0 }
  0x50   :  { %694 = vmatpush3.bf16.msra.mxu1 %v773_v17  ;;  %p901_p1 = pnand %p900_p0, %p894_p11 }
  0x51   :  { %695 = vmatprep.subr.bf16.mxu1 %v929_v1 }
  0x52   :  { %230 = vmatpush1.bf16.msra.mxu0 %v761_v11 }
  0x53   :  { %231 = vmatprep.subr.bf16.mxu0 %v928_v0 }
  0x54   :  { %696 = vmatpush3.bf16.msra.mxu1 %v774_v19 }
  0x55   :  { %697 = vmatprep.subr.bf16.mxu1 %v929_v1 }
  0x56   :  { %232 = vmatpush1.bf16.msra.mxu0 %v762_v13 }
  0x57   :  { %233 = vmatprep.subr.bf16.mxu0 %v928_v0 }
  0x58   :  { %698 = vmatpush3.bf16.msra.mxu1 %v775_v26 }
  0x59   :  { %699 = vmatprep.subr.bf16.mxu1 %v929_v1 }
  0x5a   :  { %234 = vmatpush1.bf16.msra.mxu0 %v763_v15 }
  0x5b   :  { %241 = vmatprep.subr.bf16.mxu0 %v928_v0 }
  0x5c   :  { %700 = vmatpush3.bf16.msra.mxu1 %v776_v27 }
  0x5d   :  { %705 = vmatprep.subr.bf16.mxu1 %v929_v1 }
  0x5e   :  { %242 = vmatpush2.bf16.msra.mxu0 %v217_v18 }
  0x5f   :  { %243 = vmatprep.subr.bf16.mxu0 %v928_v0 }
  0x62   :  { %244 = vmatpush2.bf16.msra.mxu0 %v765_v20 }
  0x63   :  { %245 = vmatprep.subr.bf16.mxu0 %v928_v0 }
  0x66   :  { %246 = vmatpush2.bf16.msra.mxu0 %v766_v21 }
  0x67   :  { %247 = vmatprep.subr.bf16.mxu0 %v928_v0 }
  0x6a   :  { %248 = vmatpush2.bf16.msra.mxu0 %v767_v22 }
  0x6b   :  { %249 = vmatprep.subr.bf16.mxu0 %v928_v0 }
  0x6e   :  { %250 = vmatpush2.bf16.msra.mxu0 %v768_v23 }
  0x6f   :  { %725 = vmatprep.subr.bf16.mxu0 %v929_v1 }
  0x71   :  { %252 = vmatmul.mubr.bf16.vlgmr.msra.gmra.mxu0 %v102_v25 }
  0x72   :  { %741 = vmatprep.mubr.msk.bf16.mxu0 %vm930_vm2, %v929_v1  ;;  %726 = vmatpush3.bf16.msra.mxu0 %v785_v44 }
  0x73   :  { %727 = vmatprep.subr.bf16.mxu0 %v929_v1 }
  0x76   :  { %728 = vmatpush3.bf16.msra.mxu0 %v786_v45 }
  0x77   :  { %729 = vmatprep.subr.bf16.mxu0 %v929_v1 }
  0x7a   :  { %730 = vmatpush3.bf16.msra.mxu0 %v787_v46 }
  0x7b   :  { %731 = vmatprep.subr.bf16.mxu0 %v929_v1 }
  0x7e   :  { %732 = vmatpush3.bf16.msra.mxu0 %v788_v47 }
  0x7f   :  { %733 = vmatprep.subr.bf16.mxu0 %v929_v1 }
  0x82   :  { %734 = vmatpush3.bf16.msra.mxu0 %v789_v48 }
  0x83   :  { %735 = vmatprep.subr.bf16.mxu0 %v929_v1 }
  0x86   :  { %736 = vmatpush3.bf16.msra.mxu0 %v790_v49 }
  0x87   :  { %737 = vmatprep.subr.bf16.mxu0 %v929_v1 }
  0x8a   :  { %738 = vmatpush3.bf16.msra.mxu0 %v791_v58 }
  0x8b   :  { %739 = vmatprep.subr.bf16.mxu0 %v929_v1 }
  0x8e   :  { %740 = vmatpush3.bf16.msra.mxu0 %v792_v59 }
 0x131   :  { %v253_v29 = vpop.f32.mrf.mxu0 }
 0x132   :  { %v254_v30 = vadd.f32 %v616_v28, %v253_v29 }
 0x133   :  { %v255_v31 = vpop.f32.mrf.mxu0 }
 0x134   :  { %v259_v32 = vmax.f32 %v254_v30, 0.0 }
 0x135   :  { %v256_v33 = vpop.f32.mrf.mxu0 }
 0x136   :  { %v260_v35 = vpack.c.bf16 %v259_v32, %v259_v32 }
 0x137   :  { %v257_v36 = vpop.f32.mrf.mxu0 }
 0x138   :  { %702 = vmatmul.mubr.bf16.vlgmr.msra.gmra.mxu1 %v260_v35 }
 0x139   :  { %706 = vmatpush3.bf16.msra.mxu1 %v777_v34  ;;  %721 = vmatprep.mubr.msk.bf16.mxu1 %vm930_vm2, %v929_v1 }
 0x13a   :  { %707 = vmatprep.subr.bf16.mxu1 %v929_v1 }
 0x13d   :  { %708 = vmatpush3.bf16.msra.mxu1 %v778_v37 }
 0x13e   :  { %709 = vmatprep.subr.bf16.mxu1 %v929_v1 }
 0x141   :  { %710 = vmatpush3.bf16.msra.mxu1 %v779_v38 }
 0x142   :  { %711 = vmatprep.subr.bf16.mxu1 %v929_v1 }
 0x145   :  { %712 = vmatpush3.bf16.msra.mxu1 %v780_v39 }
 0x146   :  { %713 = vmatprep.subr.bf16.mxu1 %v929_v1 }
 0x149   :  { %714 = vmatpush3.bf16.msra.mxu1 %v781_v40 }
 0x14a   :  { %715 = vmatprep.subr.bf16.mxu1 %v929_v1 }
 0x14d   :  { %716 = vmatpush3.bf16.msra.mxu1 %v782_v41 }
 0x14e   :  { %717 = vmatprep.subr.bf16.mxu1 %v929_v1 }
 0x151   :  { %718 = vmatpush3.bf16.msra.mxu1 %v783_v42 }
 0x152   :  { %719 = vmatprep.subr.bf16.mxu1 %v929_v1 }
 0x155   :  { %720 = vmatpush3.bf16.msra.mxu1 %v784_v43 }
 0x1f8   :  { %v366_v51 = vpop.f32.mrf.mxu1 }
 0x1f9   :  { %v367_v52 = vadd.f32 %v631_v50, %v366_v51 }
 0x1fa   :  { %v703_v53 = vpop.f32.mrf.mxu1 }
 0x1fb   :  { %v372_v54 = vmax.f32 %v367_v52, 0.0 }
 0x1fc   :  { %v369_v55 = vpop.f32.mrf.mxu1 }
 0x1fd   :  { %v373_v56 = vpack.c.bf16 %v372_v54, %v372_v54 }
 0x1fe   :  { %v704_v57 = vpop.f32.mrf.mxu1 }
 0x1ff   :  { %722 = vmatmul.mubr.bf16.vlgmr.msra.gmra.mxu1 %v373_v56 }
 0x2bf   :  { %v479_v61 = vpop.f32.mrf.mxu1 }
 0x2c0   :  { %v480_v62 = vadd.f32 %v640_v60, %v479_v61 }
 0x2c1   :  { %v723_v63 = vpop.f32.mrf.mxu1 }
 0x2c2   :  { %v485_v0 = vmax.f32 %v480_v62, 0.0 }
 0x2c3   :  { %v482_v2 = vpop.f32.mrf.mxu1 }
 0x2c4   :  { %v486_v3 = vpack.c.bf16 %v485_v0, %v485_v0 }
 0x2c5   :  { %v724_v4 = vpop.f32.mrf.mxu1 }
 0x2c6   :  { %742 = vmatmul.mubr.bf16.vlgmr.msra.gmra.mxu0 %v486_v3 }
 0x386   :  { %v592_v1 = vpop.f32.mrf.mxu0 }
 0x387   :  { %v593_v6 = vadd.f32 %v649_v5, %v592_v1 }
 0x388   :  { %v743_v7 = vpop.f32.mrf.mxu0 }
 0x389   :  { %598 = vst [vmem:[#allocation11] sm:$0xff] %v593_v6 }
 0x38a   :  { %v595_v8 = vpop.f32.mrf.mxu0 }
 0x38b   :  { %904 = shalt.err (!%p901_p1)
}
 0x38c   :  { %608 = dma.vmem_to_hbm [thread:$0]  %s606_s17, 128, %s1074_s9, [#allocation4]   ;;  %v744_v9 = vpop.f32.mrf.mxu0 }
 0x38d   :  { %919 = dma.done.wait [#allocation4], 128  }
 0x38e   :  { %920 = vsyncadd [#allocation4], 4294967168 }
 0x38f   :  { %612 = vsyncpa [#allocation3], 1 }
 0x390   :  { %613 = vsyncpa [#allocation6], 1 }
 0x391   :  { %614 = vsyncpa [#allocation9], 1 }
 0x392   :  { %615 = vsyncpa [#allocation4], 1 }

</bundles_post_ra>
